<compile_context>
chip_gen: v7x
topology: tpu7x:2x2x1
jax: 0.10.0
libtpu: 0.0.40
codegen_flags: <defaults>
</compile_context>

<pallas_src>
import functools

import jax
import jax.numpy as jnp
from jax.experimental import pallas as pl
from jax.experimental.pallas import tpu as pltpu


def _round_up(x, m):
    return ((x + m - 1) // m) * m


def _is_old_tpu():
    """v5e and older: no bf16 VPU/EUP path and a smaller scoped-VMEM default."""
    try:
        kind = jax.devices()[0].device_kind.lower()
    except Exception:
        return True
    return any(tag in kind for tag in ("v2", "v3", "v4", "v5"))


def _semantic_voxel_kernel(v_ref, c_ref, p_ref, o_ref, acc_ref, *,
                           inv_two_sigma_sq, compute_dtype):
    """One (batch, voxel-tile, vertex-tile) grid step.

    v_ref:   (1, TNv, 3)  surface vertices (f32)
    c_ref:   (4, TNv)     [codes; ones] in compute dtype
    p_ref:   (4, TG)      [2s*px, 2s*py, 2s*pz, s*|p|^2] (f32)
    o_ref:   (1, 3, TG)   normalized semantic codes (written at last vertex tile)
    acc_ref: (4, TG)      f32 accumulator: rows 0-2 numerator, row 3 weight sum
    """
    k = pl.program_id(2)

    @pl.when(k == 0)
    def _init():
        acc_ref[...] = jnp.zeros_like(acc_ref)

    x = v_ref[0]                                                      # (TNv, 3) f32
    sx_sq = jnp.sum(x * x, axis=-1, keepdims=True) * inv_two_sigma_sq  # (TNv, 1)

    pv = p_ref[...]                                                   # (4, TG) f32
    # 2s * <x, p> on the MXU (K = 3), f32 accumulation.
    cross = jnp.dot(x.astype(compute_dtype),
                    pv[0:3, :].astype(compute_dtype),
                    preferred_element_type=jnp.float32)               # (TNv, TG)
    # -s * ||x - p||^2  (can be a hair above 0 from cancellation; harmless).
    arg = cross - sx_sq - pv[3:4, :]
    w = jnp.exp(arg.astype(compute_dtype))                            # (TNv, TG)

    # Fused numerator + denominator in one lane-dense matmul.
    acc_ref[...] += jnp.dot(c_ref[...], w,
                            preferred_element_type=jnp.float32)       # (4, TG)

    @pl.when(k == pl.num_programs(2) - 1)
    def _finalize():
        acc = acc_ref[...]
        o_ref[0] = acc[0:3, :] / (acc[3:4, :] + 0.001)


def semantic_voxelization(verts_surface, vertex_code, volume_res, sigma,
                          *, tile_g=None, tile_nv=1024, compute_dtype=None):
    """Gaussian splat of per-vertex codes onto an R^3 grid. Returns (B,3,R,R,R) f32."""
    B, nv, _ = verts_surface.shape
    R = int(volume_res)
    G = R ** 3
    s = 1.0 / (2.0 * float(sigma) * float(sigma))

    old_tpu = _is_old_tpu()
    if compute_dtype is None:
        # bf16 exp/MXU on v6e/v7x (bf16 EUP/VPU paths), f32 on v5e and older.
        compute_dtype = jnp.float32 if old_tpu else jnp.bfloat16
    if tile_g is None:
        # Sized so live (TNv, TG) intermediates stay well under the default
        # scoped-VMEM limits (16 MiB v5e, 32 MiB v6e/v7x).
        tile_g = 512 if old_tpu else 1024
    assert tile_g % 128 == 0 and tile_nv % 128 == 0

    tg = min(tile_g, _round_up(G, 128))
    tnv = min(tile_nv, _round_up(nv, 128))
    g_pad = _round_up(G, tg)
    nv_pad = _round_up(nv, tnv)

    # Vertices: pad with far-away dummies so their Gaussian weight underflows to 0.
    verts = verts_surface.astype(jnp.float32)
    if nv_pad > nv:
        verts = jnp.pad(verts, ((0, 0), (0, nv_pad - nv), (0, 0)),
                        constant_values=1e4)

    # Codes with an appended row of ones -> single matmul gives numer + denom.
    # Shared across the batch: passed once (index_map ignores b), never tiled by B.
    code_t = vertex_code.astype(jnp.float32).T                         # (3, nv)
    codes_aug = jnp.concatenate(
        [code_t, jnp.ones((1, nv), jnp.float32)], axis=0)              # (4, nv)
    if nv_pad > nv:
        codes_aug = jnp.pad(codes_aug, ((0, 0), (0, nv_pad - nv)))
    codes_aug = codes_aug.astype(compute_dtype)

    # Voxel-center side, prepacked lane-dense and scale-folded:
    # rows 0-2 = 2s * center, row 3 = s * |center|^2.  Grid spans [-0.5, 0.5].
    coords = (jnp.arange(R, dtype=jnp.float32) + 0.5) / R - 0.5
    gx, gy, gz = jnp.meshgrid(coords, coords, coords, indexing="ij")
    centers = jnp.stack([gx, gy, gz], axis=-1).reshape(G, 3)
    if g_pad > G:
        centers = jnp.pad(centers, ((0, g_pad - G), (0, 0)))
    pvox = jnp.concatenate(
        [centers.T * (2.0 * s),
         jnp.sum(centers * centers, axis=-1)[None, :] * s],
        axis=0)                                                        # (4, g_pad) f32

    kernel = functools.partial(_semantic_voxel_kernel,
                               inv_two_sigma_sq=s,
                               compute_dtype=compute_dtype)

    out = pl.pallas_call(
        kernel,
        out_shape=jax.ShapeDtypeStruct((B, 3, g_pad), jnp.float32),
        grid_spec=pltpu.PrefetchScalarGridSpec(
            num_scalar_prefetch=0,
            grid=(B, g_pad // tg, nv_pad // tnv),          # vertex reduction last
            in_specs=[
                pl.BlockSpec((1, tnv, 3), lambda b, g, k: (b, k, 0)),  # vertices
                pl.BlockSpec((4, tnv), lambda b, g, k: (0, k)),        # codes+ones
                pl.BlockSpec((4, tg), lambda b, g, k: (0, g)),         # voxel centers
            ],
            out_specs=pl.BlockSpec((1, 3, tg), lambda b, g, k: (b, 0, g)),
            scratch_shapes=[pltpu.VMEM((4, tg), jnp.float32)],
        ),
        compiler_params=pltpu.CompilerParams(
            dimension_semantics=("parallel", "parallel", "arbitrary")),
    )(verts, codes_aug, pvox)

    # Already channels-first: just drop padding and reshape (no HBM transpose).
    return out[:, :, :G].reshape(B, 3, R, R, R)


def voxelization_forward(smpl_vertices, smpl_vertex_code, smpl_face_indices,
                         smpl_tet_indices, volume_res, sigma):
    """Mirrors Voxelization.forward. Returns (B, 3, R, R, R) float32."""
    B, Nv, _ = smpl_vertices.shape
    Nv_surf = smpl_vertex_code.shape[0]
    batch_idx = jnp.arange(B, dtype=jnp.int32)[:, None, None]

    # --- glue mirroring the PyTorch module (faces / tets / centers / normals).
    # These are handed to the CUDA autograd Function but unused by its forward.
    faces = smpl_vertices[batch_idx, smpl_face_indices[None, :, :], :]   # (B,Nf,3,3)
    tets = smpl_vertices[batch_idx, smpl_tet_indices[None, :, :], :]     # (B,Nt,4,3)
    face_centers = (faces[:, :, 0] + faces[:, :, 1] + faces[:, :, 2]) / 3.0
    v10 = faces[:, :, 0] - faces[:, :, 1]
    v12 = faces[:, :, 2] - faces[:, :, 1]
    nrm = jnp.cross(v10, v12)
    face_normals = nrm / jnp.maximum(
        jnp.linalg.norm(nrm, axis=-1, keepdims=True), 1e-5)
    del tets, face_centers, face_normals  # computed for parity, not consumed

    # --- hot path: semantic voxelization of the surface vertices.
    verts_surface = smpl_vertices[:, :Nv_surf, :]
    return semantic_voxelization(verts_surface, smpl_vertex_code,
                                 volume_res, sigma)


def _semantic_voxelization_reference(verts, codes, volume_res, sigma):
    """Pure-JAX reference (elementwise distances, no MXU) for validation."""
    B = verts.shape[0]
    R = int(volume_res)
    coords = (jnp.arange(R, dtype=jnp.float32) + 0.5) / R - 0.5
    gx, gy, gz = jnp.meshgrid(coords, coords, coords, indexing="ij")
    centers = jnp.stack([gx, gy, gz], axis=-1).reshape(-1, 3)           # (G, 3)
    d2 = jnp.sum((verts[:, :, None, :] - centers[None, None, :, :]) ** 2, -1)
    w = jnp.exp(-d2 / (2.0 * float(sigma) ** 2))                        # (B, Nv, G)
    numer = jnp.sum(w[..., None] * codes[None, :, None, :], axis=1)     # (B, G, 3)
    denom = jnp.sum(w, axis=1)[..., None] + 0.001
    sem = (numer / denom).reshape(B, R, R, R, 3)
    return jnp.transpose(sem, (0, 4, 1, 2, 3))


if __name__ == "__main__":
    key = jax.random.PRNGKey(0)
    k1, k2, k3, k4, k5, k6 = jax.random.split(key, 6)

    # Small, deterministic synthetic "SMPL" setup.
    B = 2            # batch_size
    Nv = 32          # total vertices (surface + extra tetra vertices)
    Nv_surf = 24     # surface vertices carrying a semantic code
    Nf = 16          # faces
    Nt = 12          # tetrahedra
    R = 8            # volume_res
    sigma = 0.1
    smooth_kernel_size = 3  # unused by the forward pass (kept for parity)

    smpl_vertices = jax.random.uniform(
        k1, (B, Nv, 3), jnp.float32, minval=-0.4, maxval=0.4)
    smpl_vertex_code = jax.random.uniform(
        k2, (Nv_surf, 3), jnp.float32, minval=0.0, maxval=1.0)
    smpl_face_indices = jax.random.randint(
        k3, (Nf, 3), 0, Nv_surf).astype(jnp.int32)
    smpl_tet_indices = jax.random.randint(
        k4, (Nt, 4), 0, Nv).astype(jnp.int32)
    # per-face code (unused by the forward, kept for parity with __init__)
    smpl_face_code = smpl_vertex_code[smpl_face_indices].mean(axis=1)

    # 1) Module-parity forward on the default (chip-dependent) compute path.
    fwd = jax.jit(functools.partial(
        voxelization_forward, volume_res=R, sigma=sigma))
    vol = fwd(smpl_vertices, smpl_vertex_code, smpl_face_indices,
              smpl_tet_indices)
    vol = jax.block_until_ready(vol)
    assert vol.shape == (B, 3, R, R, R), vol.shape
    assert vol.dtype == jnp.float32
    assert bool(jnp.all(jnp.isfinite(vol)))

    # 2) Numerics check (f32 path) on a multi-tile grid (2 vertex tiles, 4 voxel
    #    tiles, padded Nv) against a pure-JAX reference.
    verts_chk = jax.random.uniform(
        k5, (2, 200, 3), jnp.float32, minval=-0.4, maxval=0.4)
    codes_chk = jax.random.uniform(
        k6, (200, 3), jnp.float32, minval=0.0, maxval=1.0)
    got = semantic_voxelization(verts_chk, codes_chk, 8, 0.3,
                                tile_g=128, tile_nv=128,
                                compute_dtype=jnp.float32)
    ref = _semantic_voxelization_reference(verts_chk, codes_chk, 8, 0.3)
    got = jax.block_until_ready(got)
    ref = jax.block_until_ready(ref)
    max_err = float(jnp.max(jnp.abs(got - ref)))
    assert max_err < 0.08, f"max abs err vs reference: {max_err}"

    print("KERNEL_OK")
</pallas_src>

<mosaic_0001>
module attributes {stable_mosaic.version = 11 : i64} {
  func.func @_semantic_voxel_kernel(%arg0: i32, %arg1: i32, %arg2: i32, %arg3: memref<1x128x3xf32, #tpu.memory_space<vmem>>, %arg4: memref<4x128xbf16, #tpu.memory_space<vmem>>, %arg5: memref<4x512xf32, #tpu.memory_space<vmem>>, %arg6: memref<1x3x512xf32, #tpu.memory_space<vmem>>, %arg7: memref<4x512xf32, #tpu.memory_space<vmem>>) attributes {dimension_semantics = [#tpu.dimension_semantics<parallel>, #tpu.dimension_semantics<parallel>, #tpu.dimension_semantics<arbitrary>], iteration_bounds = array<i64: 2, 1, 1>, scalar_prefetch = 0 : i64, scratch_operands = 1 : i64, tpu.core_type = #tpu.core_type<tc>, window_params = [{transform_indices = @transform_0, window_bounds = array<i64: 1, 128, 3>}, {transform_indices = @transform_1, window_bounds = array<i64: 4, 128>}, {transform_indices = @transform_2, window_bounds = array<i64: 4, 512>}, {transform_indices = @transform_3, window_bounds = array<i64: 1, 3, 512>}]} {
    %c0_i32 = arith.constant 0 : i32
    %0 = arith.cmpi eq, %arg2, %c0_i32 : i32
    %1 = arith.extui %0 : i1 to i32
    %c0_i32_0 = arith.constant 0 : i32
    %2 = arith.cmpi ne, %1, %c0_i32_0 : i32
    scf.if %2 {
      %cst_16 = arith.constant 0.000000e+00 : f32
      %30 = vector.broadcast %cst_16 : f32 to vector<4x512xf32>
      %c0_17 = arith.constant 0 : index
      %c0_18 = arith.constant 0 : index
      %31 = vector.load %arg7[%c0_17, %c0_18] : memref<4x512xf32, #tpu.memory_space<vmem>>, vector<4x512xf32>
      tpu.vector_store %arg7[%c0_17, %c0_18], %30 {strides = array<i32>} : memref<4x512xf32, #tpu.memory_space<vmem>>, vector<4x512xf32>,
    } else {
    }
    %c0 = arith.constant 0 : index
    %c0_1 = arith.constant 0 : index
    %c0_2 = arith.constant 0 : index
    %3 = vector.load %arg3[%c0, %c0_1, %c0_2] : memref<1x128x3xf32, #tpu.memory_space<vmem>>, vector<1x128x3xf32>
    %4 = vector.shape_cast %3 : vector<1x128x3xf32> to vector<128x3xf32>
    %5 = arith.mulf %4, %4 : vector<128x3xf32>
    %cst = arith.constant dense<0.000000e+00> : vector<128xf32>
    %6 = vector.multi_reduction <add>, %5, %cst [1] : vector<128x3xf32> to vector<128xf32>
    %7 = vector.shape_cast %6 : vector<128xf32> to vector<128x1xf32>
    %cst_3 = arith.constant 5.000000e+01 : f32
    %8 = vector.broadcast %cst_3 : f32 to vector<128x1xf32>
    %9 = arith.mulf %7, %8 : vector<128x1xf32>
    %c0_4 = arith.constant 0 : index
    %c0_5 = arith.constant 0 : index
    %10 = vector.load %arg5[%c0_4, %c0_5] : memref<4x512xf32, #tpu.memory_space<vmem>>, vector<4x512xf32>
    %11 = arith.truncf %4 : vector<128x3xf32> to vector<128x3xbf16>
    %12 = vector.extract_strided_slice %10 {offsets = [0, 0], sizes = [3, 512], strides = [1, 1]} : vector<4x512xf32> to vector<3x512xf32>
    %13 = arith.truncf %12 : vector<3x512xf32> to vector<3x512xbf16>
    %cst_6 = arith.constant dense<0.000000e+00> : vector<128x512xf32>
    %14 = tpu.matmul %11, %13, %cst_6 {dimension_numbers = #tpu.dot_dimension_numbers<[1], [0], [0], [1], [0, 0, 1, 1], [], []>} : vector<128x3xbf16>, vector<3x512xbf16>, vector<128x512xf32> -> vector<128x512xf32>
    %15 = vector.broadcast %9 : vector<128x1xf32> to vector<128x512xf32>
    %16 = arith.subf %14, %15 : vector<128x512xf32>
    %17 = vector.extract_strided_slice %10 {offsets = [3, 0], sizes = [1, 512], strides = [1, 1]} : vector<4x512xf32> to vector<1x512xf32>
    %18 = vector.broadcast %17 : vector<1x512xf32> to vector<128x512xf32>
    %19 = arith.subf %16, %18 : vector<128x512xf32>
    %20 = arith.truncf %19 : vector<128x512xf32> to vector<128x512xbf16>
    %21 = math.exp %20 : vector<128x512xbf16>
    %c0_7 = arith.constant 0 : index
    %c0_8 = arith.constant 0 : index
    %22 = vector.load %arg7[%c0_7, %c0_8] : memref<4x512xf32, #tpu.memory_space<vmem>>, vector<4x512xf32>
    %c0_9 = arith.constant 0 : index
    %c0_10 = arith.constant 0 : index
    %23 = vector.load %arg4[%c0_9, %c0_10] : memref<4x128xbf16, #tpu.memory_space<vmem>>, vector<4x128xbf16>
    %cst_11 = arith.constant dense<0.000000e+00> : vector<4x512xf32>
    %24 = tpu.matmul %23, %21, %cst_11 {dimension_numbers = #tpu.dot_dimension_numbers<[1], [0], [0], [1], [0, 0, 1, 1], [], []>} : vector<4x128xbf16>, vector<128x512xbf16>, vector<4x512xf32> -> vector<4x512xf32>
    %25 = arith.addf %22, %24 : vector<4x512xf32>
    %c0_12 = arith.constant 0 : index
    %c0_13 = arith.constant 0 : index
    %26 = vector.load %arg7[%c0_12, %c0_13] : memref<4x512xf32, #tpu.memory_space<vmem>>, vector<4x512xf32>
    tpu.vector_store %arg7[%c0_12, %c0_13], %25 {strides = array<i32>} : memref<4x512xf32, #tpu.memory_space<vmem>>, vector<4x512xf32>,
    %c0_i32_14 = arith.constant 0 : i32
    %27 = arith.cmpi eq, %arg2, %c0_i32_14 : i32
    %28 = arith.extui %27 : i1 to i32
    %c0_i32_15 = arith.constant 0 : i32
    %29 = arith.cmpi ne, %28, %c0_i32_15 : i32
    scf.if %29 {
      %c0_16 = arith.constant 0 : index
      %c0_17 = arith.constant 0 : index
      %30 = vector.load %arg7[%c0_16, %c0_17] : memref<4x512xf32, #tpu.memory_space<vmem>>, vector<4x512xf32>
      %31 = vector.extract_strided_slice %30 {offsets = [0, 0], sizes = [3, 512], strides = [1, 1]} : vector<4x512xf32> to vector<3x512xf32>
      %32 = vector.extract_strided_slice %30 {offsets = [3, 0], sizes = [1, 512], strides = [1, 1]} : vector<4x512xf32> to vector<1x512xf32>
      %cst_18 = arith.constant 1.000000e-03 : f32
      %33 = vector.broadcast %cst_18 : f32 to vector<1x512xf32>
      %34 = arith.addf %32, %33 : vector<1x512xf32>
      %35 = vector.broadcast %34 : vector<1x512xf32> to vector<3x512xf32>
      %36 = arith.divf %31, %35 : vector<3x512xf32>
      %c0_19 = arith.constant 0 : index
      %c0_20 = arith.constant 0 : index
      %c0_21 = arith.constant 0 : index
      %37 = vector.load %arg6[%c0_19, %c0_20, %c0_21] : memref<1x3x512xf32, #tpu.memory_space<vmem>>, vector<1x3x512xf32>
      %38 = vector.shape_cast %37 : vector<1x3x512xf32> to vector<3x512xf32>
      %39 = vector.shape_cast %36 : vector<3x512xf32> to vector<1x3x512xf32>
      tpu.vector_store %arg6[%c0_19, %c0_20, %c0_21], %39 {strides = array<i32>} : memref<1x3x512xf32, #tpu.memory_space<vmem>>, vector<1x3x512xf32>,
    } else {
    }
    return
  }
  func.func @transform_0(%arg0: i32, %arg1: i32, %arg2: i32) -> (i32, i32, i32) {
    %c0_i32 = arith.constant 0 : i32
    %c0_i32_0 = arith.constant 0 : i32
    return %arg0, %arg2, %c0_i32 : i32, i32, i32
  }
  func.func @transform_1(%arg0: i32, %arg1: i32, %arg2: i32) -> (i32, i32) {
    %c0_i32 = arith.constant 0 : i32
    %c0_i32_0 = arith.constant 0 : i32
    return %c0_i32, %arg2 : i32, i32
  }
  func.func @transform_2(%arg0: i32, %arg1: i32, %arg2: i32) -> (i32, i32) {
    %c0_i32 = arith.constant 0 : i32
    %c0_i32_0 = arith.constant 0 : i32
    return %c0_i32, %arg1 : i32, i32
  }
  func.func @transform_3(%arg0: i32, %arg1: i32, %arg2: i32) -> (i32, i32, i32) {
    %c0_i32 = arith.constant 0 : i32
    %c0_i32_0 = arith.constant 0 : i32
    return %arg0, %c0_i32, %arg1 : i32, i32, i32
  }
}

</mosaic_0001>

<bundles_post_ra>
// kernel: voxelization_forward.1
= control target key start
LH: loop header
LB: loop body
LE: loop exit
PB: predicated region body
PF: predicated region fallthrough
CT: control target
= control target key end

     0   :  { %s1387_s12 = smov 0   ;;  %s1389_s13 = smov 0   ;;  %s1609_s0 = inlined_call_operand.vmem [shape: f32[2,128,3], index: 0, kind: input, shape index: {}]   ;;  %s1610_s1 = inlined_call_operand.vmem [shape: bf16[4,128], index: 1, kind: input, shape index: {}]   ;;  %s1611_s2 = inlined_call_operand.vmem [shape: f32[4,512], index: 2, kind: input, shape index: {}]   ;;  %s1612_s3 = inlined_call_operand.vmem [shape: f32[2,3,512], index: 3, kind: output, shape index: {}]  }
   0x1   :  { %s1391_s14 = smov 0  }
   0x2 LB: > { %s32_s15 = sadd.s32 1, %s1359_s13  ;;  %p1220_p0 = scmp.ge.s32.totalorder %s1363_s14, 1  ;;  %s1363_s14 = sphi %s1391_s14, %s13_s14   ;;  %s1359_s13 = sphi %s1389_s13, %s1614_s13   ;;  %s1355_s12 = sphi %s1387_s12, %s1613_s12  }
   0x3   : > { %p34_p1 = scmp.ge.s32.totalorder %s32_s15, 2  ;;  %p185_p2 = scmp.lt.s32.totalorder %s1363_s14, 3 }
   0x5   : > { %s1616_s15 = smov (%p34_p1, %s32_s15), 0  ;;  %p186_p3 = pnand %p1220_p0, %p185_p2 }
   0x6   : > { %v1408_v0 = vld [vmem:[%s1611_s2] sm:$0xff] (!%p186_p3)  ;;  %vm404_vm0 = vcmask (!%p186_p3), 1040384   ;;  %vm405_vm1 = vcmask (!%p186_p3), 1041408   ;;  %v1413_v1 = vld [vmem:[%s1611_s2 + $0x8] sm:$0xff] (!%p186_p3)  ;;  %p227_p4 = scmp.lt.s32.totalorder (!%p186_p3), %s1355_s12, 1  ;;  %v1365_v3 = vmov (!%p186_p3), 65535  }
   0x7   : > { %189 = sbr.rel (%p186_p3) target bundleno = 554 (0x22a), region = 32  ;;  %v372_v2 = vcombine.high (!%p186_p3), %v1408_v0, %v1408_v0  ;;  %v406_v4 = vsel (!%p186_p3), %vm404_vm0, 4294967295, %v1365_v3  ;;  %v373_v5 = vcombine.high (!%p186_p3), %v1413_v1, %v1413_v1  ;;  %v376_v6 = vpack.c.bf16 (!%p186_p3), %v1408_v0, %v1408_v0 }
   0x8   : > { %v407_v7 = vsel (!%p186_p3), %vm405_vm1, %v406_v4, 0  ;;  %v378_v8 = vpack.c.bf16 (!%p186_p3), %v1413_v1, %v1413_v1  ;;  %v1366_v11 = vmov (!%p186_p3), 0   ;;  %vm295_vm2 = vcmask (!%p186_p3), 23552  }
   0x9   : > { %v377_v9 = vpack.c.bf16 (!%p186_p3), %v372_v2, %v372_v2  ;;  %v379_v10 = vpack.c.bf16 (!%p186_p3), %v373_v5, %v373_v5  ;;  %452 = vmatprep.mubr.bf16.mxu0 (!%p186_p3), %v1366_v11  ;;  %565 = vmatprep.mubr.bf16.mxu1 (!%p186_p3), %v1366_v11  ;;  %v409_v12 = vand.u32 (!%p186_p3), %v407_v7, %v376_v6 }
   0xa   : > { %v415_v15 = vand.u32 (!%p186_p3), %v407_v7, %v378_v8 }
   0xb   : > { %v412_v13 = vand.u32 (!%p186_p3), %v407_v7, %v377_v9  ;;  %v418_v14 = vand.u32 (!%p186_p3), %v407_v7, %v379_v10  ;;  %v710_v10 = vlaneseq (!%p186_p3) }
   0xd   : > { %420 = vmatprep.subr.bf16.mxu0 (!%p186_p3), %v412_v13  ;;  %533 = vmatprep.subr.bf16.mxu1 (!%p186_p3), %v418_v14 }
   0xe   : > { %s1618_s12 = smov (!%p227_p4, %s1355_s12), 1  ;;  %421 = vmatpush1.bf16.msra.mxu0 %v409_v12  ;;  %534 = vmatpush1.bf16.msra.mxu1 %v415_v15  ;;  %v711_v12 = vshrl.u32 %v710_v10, 7 }
   0xf   : > { %s1243_s20 = sshll.u32 %s1618_s12, 7  ;;  %s1244_s26 = sshll.u32 %s1618_s12, 4 }
  0x10   : > { %s1431_s23 = scalar_lea.vmem %s1609_s0, %s1243_s20  ;;  %v1497_v14 = vsub.s32 3, %v711_v12  ;;  %v1499_v15 = vsub.s32 7, %v711_v12  ;;  %s254_s29 = scalar_lea.vmem %s1612_s3, %s1244_s26 }
  0x11   : > { %v263_v16 = vld [vmem:[%s1431_s23] sm:$0xff]  ;;  %v264_v17 = vld [vmem:[%s1431_s23 + $0x8] sm:$0xff]  ;;  %v265_v21 = vld [vmem:[%s1431_s23 + $0x10] sm:$0xff] }
  0x12   : > { %v362_v18 = vpack.c.bf16 %v264_v17, %v263_v16  ;;  %v279_v19 = vmul.f32 %v263_v16, %v263_v16  ;;  %v280_v20 = vmul.f32 %v264_v17, %v264_v17  ;;  %v266_v23 = vld [vmem:[%s1431_s23 + $0x18] sm:$0xff]  ;;  %v267_v24 = vld [vmem:[%s1431_s23 + $0x20] sm:$0xff]  ;;  %v281_v25 = vmul.f32 %v265_v21, %v265_v21  ;;  %v268_v30 = vld [vmem:[%s1431_s23 + $0x28] sm:$0xff] }
  0x13   : > { %v282_v27 = vmul.f32 %v266_v23, %v266_v23  ;;  %v283_v28 = vmul.f32 %v267_v24, %v267_v24  ;;  %v269_v31 = vld [vmem:[%s1431_s23 + $0x30] sm:$0xff]  ;;  %v284_v33 = vmul.f32 %v268_v30, %v268_v30  ;;  %v363_v34 = vpack.c.bf16 %v266_v23, %v265_v21  ;;  %v270_v37 = vld [vmem:[%s1431_s23 + $0x38] sm:$0xff]  ;;  %v271_v38 = vld [vmem:[%s1431_s23 + $0x40] sm:$0xff] }
  0x14   : > { %v296_v22 = vsel %vm295_vm2, %v279_v19, 0.0  ;;  %1225 = vmatmul.mubr.msk.bf16.vlgmr.msra.gmra.mrb[0].mxu0 %vm295_vm2, %v362_v18  ;;  %v299_v26 = vsel %vm295_vm2, %v280_v20, 0.0  ;;  %1233 = vmatmul.mubr.msk.bf16.vlgmr.msra.gmra.mrb[0].mxu1 %vm295_vm2, %v362_v18  ;;  %v302_v29 = vsel %vm295_vm2, %v281_v25, 0.0  ;;  %v285_v36 = vmul.f32 %v269_v31, %v269_v31  ;;  %v272_v43 = vld [vmem:[%s1431_s23 + $0x48] sm:$0xff]  ;;  %v273_v44 = vld [vmem:[%s1431_s23 + $0x50] sm:$0xff]  ;;  %v274_v50 = vld [vmem:[%s1431_s23 + $0x58] sm:$0xff] }
  0x15   : > { %297 = vadd.xlane.f32.xlu0 %v296_v22  ;;  %462 = vmatprep.mubr.bf16.mxu0 %v1366_v11  ;;  %v305_v32 = vsel %vm295_vm2, %v282_v27, 0.0  ;;  %v308_v35 = vsel %vm295_vm2, %v283_v28, 0.0  ;;  %v311_v39 = vsel %vm295_vm2, %v284_v33, 0.0  ;;  %v286_v40 = vmul.f32 %v270_v37, %v270_v37  ;;  %v275_v51 = vld [vmem:[%s1431_s23 + $0x60] sm:$0xff]  ;;  %v276_v56 = vld [vmem:[%s1431_s23 + $0x68] sm:$0xff]  ;;  %v277_v57 = vld [vmem:[%s1431_s23 + $0x70] sm:$0xff] }
  0x16   : > { %575 = vmatprep.mubr.bf16.mxu1 %v1366_v11  ;;  %303 = vadd.xlane.f32.xlu1 %v302_v29  ;;  %v314_v41 = vsel %vm295_vm2, %v285_v36, 0.0  ;;  %v287_v42 = vmul.f32 %v271_v38, %v271_v38  ;;  %v288_v46 = vmul.f32 %v272_v43, %v272_v43  ;;  %v364_v47 = vpack.c.bf16 %v268_v30, %v267_v24  ;;  %v278_v63 = vld [vmem:[%s1431_s23 + $0x78] sm:$0xff] }
  0x17   : > { %v317_v45 = vsel %vm295_vm2, %v286_v40, 0.0  ;;  %v289_v49 = vmul.f32 %v273_v44, %v273_v44  ;;  %v290_v53 = vmul.f32 %v274_v50, %v274_v50  ;;  %v291_v55 = vmul.f32 %v275_v51, %v275_v51 }
  0x18   : > { %v320_v48 = vsel %vm295_vm2, %v287_v42, 0.0  ;;  %v323_v52 = vsel %vm295_vm2, %v288_v46, 0.0  ;;  %v292_v59 = vmul.f32 %v276_v56, %v276_v56  ;;  %v365_v60 = vpack.c.bf16 %v270_v37, %v269_v31 }
  0x19   : > { %300 = vadd.xlane.f32.xlu0 %v299_v26  ;;  %v326_v54 = vsel %vm295_vm2, %v289_v49, 0.0  ;;  %v329_v58 = vsel %vm295_vm2, %v290_v53, 0.0  ;;  %v332_v61 = vsel %vm295_vm2, %v291_v55, 0.0  ;;  %v293_v62 = vmul.f32 %v277_v57, %v277_v57 }
  0x1a   : > { %306 = vadd.xlane.f32.xlu1 %v305_v32  ;;  %v335_v2 = vsel %vm295_vm2, %v292_v59, 0.0  ;;  %v294_v3 = vmul.f32 %v278_v63, %v278_v63  ;;  %v366_v6 = vpack.c.bf16 %v272_v43, %v271_v38  ;;  %v367_v7 = vpack.c.bf16 %v274_v50, %v273_v44 }
  0x1b   : > { %v338_v4 = vsel %vm295_vm2, %v293_v62, 0.0  ;;  %v368_v8 = vpack.c.bf16 %v276_v56, %v275_v51  ;;  %v369_v9 = vpack.c.bf16 %v278_v63, %v277_v57  ;;  %v713_v16 = vrot.slane %v1408_v0, %v1497_v14 }
  0x1c   : > { %1226 = vmatmul.mubr.msk.bf16.gmra.mrb[4].mxu0 %vm295_vm2, %v363_v34  ;;  %1234 = vmatmul.mubr.msk.bf16.gmra.mrb[4].mxu1 %vm295_vm2, %v363_v34  ;;  %v341_v5 = vsel %vm295_vm2, %v294_v3, 0.0  ;;  %v717_v17 = vrot.slane %v1408_v0, %v1499_v15  ;;  %v721_v18 = vrot.slane %v1413_v1, %v1497_v14 }
  0x1d   : > { %309 = vadd.xlane.f32.xlu0 %v308_v35  ;;  %472 = vmatprep.mubr.bf16.mxu0 %v1366_v11  ;;  %v1510_v21 = vrot.slane %v713_v16, %v1497_v14 }
  0x1e   : > { %585 = vmatprep.mubr.bf16.mxu1 %v1366_v11  ;;  %312 = vadd.xlane.f32.xlu1 %v311_v39  ;;  %v1513_v24 = vrot.slane %v717_v17, %v1497_v14  ;;  %v1516_v25 = vrot.slane %v721_v18, %v1497_v14 }
  0x21   : > { %315 = vadd.xlane.f32.xlu0 %v314_v41 }
  0x22   : > { %318 = vadd.xlane.f32.xlu1 %v317_v45 }
  0x24   : > { %1227 = vmatmul.mubr.msk.bf16.gmra.mrb[8].mxu0 %vm295_vm2, %v364_v47  ;;  %1235 = vmatmul.mubr.msk.bf16.gmra.mrb[8].mxu1 %vm295_vm2, %v364_v47 }
  0x25   : > { %321 = vadd.xlane.f32.xlu0 %v320_v48  ;;  %482 = vmatprep.mubr.bf16.mxu0 %v1366_v11 }
  0x26   : > { %595 = vmatprep.mubr.bf16.mxu1 %v1366_v11  ;;  %324 = vadd.xlane.f32.xlu1 %v323_v52 }
  0x29   : > { %327 = vadd.xlane.f32.xlu0 %v326_v54 }
  0x2a   : > { %330 = vadd.xlane.f32.xlu1 %v329_v58 }
  0x2c   : > { %1228 = vmatmul.mubr.msk.bf16.gmra.mrb[12].mxu0 %vm295_vm2, %v365_v60  ;;  %1236 = vmatmul.mubr.msk.bf16.gmra.mrb[12].mxu1 %vm295_vm2, %v365_v60 }
  0x2d   : > { %333 = vadd.xlane.f32.xlu0 %v332_v61  ;;  %492 = vmatprep.mubr.bf16.mxu0 %v1366_v11 }
  0x2e   : > { %605 = vmatprep.mubr.bf16.mxu1 %v1366_v11  ;;  %336 = vadd.xlane.f32.xlu1 %v335_v2 }
  0x31   : > { %339 = vadd.xlane.f32.xlu0 %v338_v4 }
  0x32   : > { %342 = vadd.xlane.f32.xlu1 %v341_v5 }
  0x34   : > { %1229 = vmatmul.mubr.msk.bf16.gmra.mrb[16].mxu0 %vm295_vm2, %v366_v6  ;;  %1237 = vmatmul.mubr.msk.bf16.gmra.mrb[16].mxu1 %vm295_vm2, %v366_v6 }
  0x35   : > { %502 = vmatprep.mubr.bf16.mxu0 %v1366_v11  ;;  %615 = vmatprep.mubr.bf16.mxu1 %v1366_v11 }
  0x3c   : > { %1230 = vmatmul.mubr.msk.bf16.gmra.mrb[20].mxu0 %vm295_vm2, %v367_v7  ;;  %1238 = vmatmul.mubr.msk.bf16.gmra.mrb[20].mxu1 %vm295_vm2, %v367_v7 }
  0x3d   : > { %512 = vmatprep.mubr.bf16.mxu0 %v1366_v11  ;;  %625 = vmatprep.mubr.bf16.mxu1 %v1366_v11 }
  0x44   : > { %1231 = vmatmul.mubr.msk.bf16.gmra.mrb[24].mxu0 %vm295_vm2, %v368_v8  ;;  %1239 = vmatmul.mubr.msk.bf16.gmra.mrb[24].mxu1 %vm295_vm2, %v368_v8 }
  0x45   : > { %522 = vmatprep.mubr.bf16.mxu0 %v1366_v11  ;;  %635 = vmatprep.mubr.bf16.mxu1 %v1366_v11 }
  0x4c   : > { %1232 = vmatmul.mubr.msk.bf16.gmra.mrb[28].mxu0 %vm295_vm2, %v369_v9  ;;  %1240 = vmatmul.mubr.msk.bf16.gmra.mrb[28].mxu1 %vm295_vm2, %v369_v9 }
  0x4d   : > { %973 = vmatprep.mubr.bf16.mxu0 %v1366_v11  ;;  %1014 = vmatprep.mubr.bf16.mxu1 %v1366_v11  ;;  %v725_v11 = vrot.slane %v1413_v1, %v1499_v15 }
  0x4f   : > { %v1519_v26 = vrot.slane %v725_v11, %v1497_v14 }
  0xa2   : > { %v298_v13 = vpop.xlane.xlu0 %297 }
  0xa3   : > { %v344_v20 = vmul.f32 50.0, %v298_v13  ;;  %v304_v23 = vpop.xlane.xlu1 %303 }
  0xa4   : > { %v346_v46 = vmul.f32 50.0, %v304_v23 }
  0xa6   : > { %v301_v19 = vpop.xlane.xlu0 %300 }
  0xa7   : > { %v345_v22 = vmul.f32 50.0, %v301_v19  ;;  %v307_v47 = vpop.xlane.xlu1 %306 }
  0xa8   : > { %v347_v55 = vmul.f32 50.0, %v307_v47 }
  0xaa   : > { %v310_v52 = vpop.xlane.xlu0 %309 }
  0xab   : > { %v348_v5 = vmul.f32 50.0, %v310_v52 }
  0xe7   : > { %v454_v0 = vpop.f32.mrb[0].mxu0  ;;  %v567_v28 = vpop.f32.mrb[0].mxu1 }
  0xe8   : > { %v646_v27 = vsub.f32 %v454_v0, %v344_v20  ;;  %v456_v29 = vpop.f32.mrb[1].mxu0  ;;  %v648_v1 = vsub.f32 %v567_v28, %v344_v20  ;;  %v569_v31 = vpop.f32.mrb[1].mxu1 }
  0xe9   : > { %v647_v30 = vsub.f32 %v456_v29, %v344_v20  ;;  %v458_v32 = vpop.f32.mrb[2].mxu0  ;;  %v649_v34 = vsub.f32 %v569_v31, %v344_v20  ;;  %v571_v36 = vpop.f32.mrb[2].mxu1 }
  0xea   : > { %v746_v33 = vsub.f32 %v646_v27, %v1510_v21  ;;  %v650_v35 = vsub.f32 %v458_v32, %v345_v22  ;;  %v460_v37 = vpop.f32.mrb[3].mxu0  ;;  %v748_v38 = vsub.f32 %v648_v1, %v1516_v25  ;;  %v652_v40 = vsub.f32 %v571_v36, %v345_v22  ;;  %v573_v42 = vpop.f32.mrb[3].mxu1 }
  0xeb   : > { %v747_v39 = vsub.f32 %v647_v30, %v1513_v24  ;;  %v651_v41 = vsub.f32 %v460_v37, %v345_v22  ;;  %v749_v43 = vsub.f32 %v649_v34, %v1519_v26  ;;  %v653_v45 = vsub.f32 %v573_v42, %v345_v22  ;;  %v313_v0 = vpop.xlane.xlu1 %312  ;;  %v316_v31 = vpop.xlane.xlu0 %315 }
  0xec   : > { %v750_v44 = vsub.f32 %v650_v35, %v1510_v21  ;;  %v752_v48 = vsub.f32 %v652_v40, %v1516_v25  ;;  %v349_v34 = vmul.f32 50.0, %v313_v0 }
  0xed   : > { %v751_v49 = vsub.f32 %v651_v41, %v1513_v24  ;;  %v753_v51 = vsub.f32 %v653_v45, %v1519_v26 }
  0xee   : > { %v810_v50 = vpack.c.bf16 %v750_v44, %v746_v33  ;;  %v812_v53 = vpack.c.bf16 %v752_v48, %v748_v38 }
  0xef   : > { %v811_v54 = vpack.c.bf16 %v751_v49, %v747_v39  ;;  %v464_v56 = vpop.f32.mrb[4].mxu0  ;;  %v813_v58 = vpack.c.bf16 %v753_v51, %v749_v43  ;;  %v577_v60 = vpop.f32.mrb[4].mxu1  ;;  %v350_v49 = vmul.f32 50.0, %v316_v31 }
  0xf0   : > { %v843_v57 = vmul.bf16 1069105081, %v810_v50  ;;  %v654_v59 = vsub.f32 %v464_v56, %v346_v46  ;;  %v466_v61 = vpop.f32.mrb[5].mxu0  ;;  %v656_v63 = vsub.f32 %v577_v60, %v346_v46  ;;  %v579_v3 = vpop.f32.mrb[5].mxu1  ;;  %v849_v6 = vmul.bf16 1069105081, %v812_v53 }
  0xf1   : > { %v846_v62 = vmul.bf16 1069105081, %v811_v54  ;;  %v655_v2 = vsub.f32 %v466_v61, %v346_v46  ;;  %v468_v4 = vpop.f32.mrb[6].mxu0  ;;  %v852_v7 = vmul.bf16 1069105081, %v813_v58  ;;  %v657_v9 = vsub.f32 %v579_v3, %v346_v46  ;;  %v581_v10 = vpop.f32.mrb[6].mxu1 }
  0xf2   : > { %v754_v8 = vsub.f32 %v654_v59, %v1510_v21  ;;  %v470_v12 = vpop.f32.mrb[7].mxu0  ;;  %1273 = vpow.bf16 %v843_v57  ;;  %v756_v13 = vsub.f32 %v656_v63, %v1516_v25  ;;  %v658_v17 = vsub.f32 %v468_v4, %v347_v55  ;;  %v583_v18 = vpop.f32.mrb[7].mxu1 }
  0xf3   : > { %v755_v16 = vsub.f32 %v655_v2, %v1513_v24  ;;  %1275 = vpow.bf16 %v846_v62  ;;  %v757_v19 = vsub.f32 %v657_v9, %v1519_v26  ;;  %v660_v11 = vsub.f32 %v581_v10, %v347_v55  ;;  %v319_v60 = vpop.xlane.xlu1 %318 }
  0xf4   : > { %v659_v20 = vsub.f32 %v470_v12, %v347_v55  ;;  %1277 = vpow.bf16 %v852_v7  ;;  %v758_v22 = vsub.f32 %v658_v17, %v1510_v21  ;;  %v661_v23 = vsub.f32 %v583_v18, %v347_v55 }
  0xf5   : > { %1279 = vpow.bf16 %v849_v6  ;;  %v760_v27 = vsub.f32 %v660_v11, %v1516_v25  ;;  %v322_v6 = vpop.xlane.xlu0 %321  ;;  %v351_v10 = vmul.f32 50.0, %v319_v60 }
  0xf6   : > { %v759_v28 = vsub.f32 %v659_v20, %v1513_v24  ;;  %v814_v29 = vpack.c.bf16 %v758_v22, %v754_v8  ;;  %v761_v1 = vsub.f32 %v661_v23, %v1519_v26 }
  0xf7   : > { %v474_v30 = vpop.f32.mrb[8].mxu0  ;;  %v816_v32 = vpack.c.bf16 %v760_v27, %v756_v13  ;;  %v587_v36 = vpop.f32.mrb[8].mxu1 }
  0xf8   : > { %v815_v33 = vpack.c.bf16 %v759_v28, %v755_v16  ;;  %v662_v35 = vsub.f32 %v474_v30, %v348_v5  ;;  %v476_v37 = vpop.f32.mrb[9].mxu0  ;;  %v855_v38 = vmul.bf16 1069105081, %v814_v29  ;;  %v817_v39 = vpack.c.bf16 %v761_v1, %v757_v19  ;;  %v589_v42 = vpop.f32.mrb[9].mxu1 }
  0xf9   : > { %v664_v40 = vsub.f32 %v587_v36, %v348_v5  ;;  %v663_v41 = vsub.f32 %v476_v37, %v348_v5  ;;  %v478_v43 = vpop.f32.mrb[10].mxu0  ;;  %v665_v46 = vsub.f32 %v589_v42, %v348_v5  ;;  %v591_v47 = vpop.f32.mrb[10].mxu1  ;;  %v861_v50 = vmul.bf16 1069105081, %v816_v32 }
  0xfa   : > { %v858_v44 = vmul.bf16 1069105081, %v815_v33  ;;  %v762_v45 = vsub.f32 %v662_v35, %v1510_v21  ;;  %v480_v48 = vpop.f32.mrb[11].mxu0  ;;  %v864_v51 = vmul.bf16 1069105081, %v817_v39  ;;  %v593_v54 = vpop.f32.mrb[11].mxu1  ;;  %1281 = vpow.bf16 %v855_v38 }
  0xfb   : > { %v764_v52 = vsub.f32 %v664_v40, %v1516_v25  ;;  %v763_v53 = vsub.f32 %v663_v41, %v1513_v24  ;;  %v765_v55 = vsub.f32 %v665_v46, %v1519_v26  ;;  %v666_v56 = vsub.f32 %v478_v43, %v349_v34  ;;  %v325_v40 = vpop.xlane.xlu1 %324 }
  0xfc   : > { %v668_v57 = vsub.f32 %v591_v47, %v349_v34  ;;  %1283 = vpow.bf16 %v858_v44  ;;  %v667_v58 = vsub.f32 %v480_v48, %v349_v34  ;;  %v669_v59 = vsub.f32 %v593_v54, %v349_v34 }
  0xfd   : > { %v1274_v61 = vpop.eup %1273  ;;  %1285 = vpow.bf16 %v864_v51  ;;  %v766_v62 = vsub.f32 %v666_v56, %v1510_v21  ;;  %v352_v30 = vmul.f32 50.0, %v322_v6  ;;  %v353_v48 = vmul.f32 50.0, %v325_v40 }
  0xfe   : > { %v768_v63 = vsub.f32 %v668_v57, %v1516_v25  ;;  %v1276_v2 = vpop.eup %1275  ;;  %1287 = vpow.bf16 %v861_v50  ;;  %v767_v3 = vsub.f32 %v667_v58, %v1513_v24  ;;  %v769_v4 = vsub.f32 %v669_v59, %v1519_v26  ;;  %v328_v50 = vpop.xlane.xlu0 %327 }
  0xff   : > { %v484_v5 = vpop.f32.mrb[12].mxu0  ;;  %v1278_v7 = vpop.eup %1277  ;;  %v818_v8 = vpack.c.bf16 %v766_v62, %v762_v45  ;;  %941 = vmatprep.subr.bf16.mxu0 %v1276_v2 }
 0x100   : > { %v820_v9 = vpack.c.bf16 %v768_v63, %v764_v52  ;;  %v670_v12 = vsub.f32 %v484_v5, %v350_v49  ;;  %v597_v13 = vpop.f32.mrb[12].mxu1  ;;  %v486_v16 = vpop.f32.mrb[13].mxu0  ;;  %v819_v18 = vpack.c.bf16 %v767_v3, %v763_v53  ;;  %v821_v19 = vpack.c.bf16 %v769_v4, %v765_v55  ;;  %982 = vmatprep.subr.bf16.mxu1 %v1278_v7 }
 0x101   : > { %v1280_v17 = vpop.eup %1279  ;;  %v672_v11 = vsub.f32 %v597_v13, %v350_v49  ;;  %v671_v20 = vsub.f32 %v486_v16, %v350_v49  ;;  %v599_v22 = vpop.f32.mrb[13].mxu1  ;;  %v867_v0 = vmul.bf16 1069105081, %v818_v8  ;;  %942 = vmatpush1.bf16.msra.mxu0 %v1274_v61  ;;  %v354_v8 = vmul.f32 50.0, %v328_v50 }
 0x102   : > { %v488_v23 = vpop.f32.mrb[14].mxu0  ;;  %v770_v27 = vsub.f32 %v670_v12, %v1510_v21  ;;  %v673_v28 = vsub.f32 %v599_v22, %v350_v49  ;;  %983 = vmatpush1.bf16.msra.mxu1 %v1280_v17  ;;  %v601_v29 = vpop.f32.mrb[14].mxu1  ;;  %v870_v31 = vmul.bf16 1069105081, %v819_v18  ;;  %v876_v32 = vmul.bf16 1069105081, %v821_v19 }
 0x103   : > { %v490_v1 = vpop.f32.mrb[15].mxu0  ;;  %v772_v33 = vsub.f32 %v672_v11, %v1516_v25  ;;  %v771_v34 = vsub.f32 %v671_v20, %v1513_v24  ;;  %v603_v35 = vpop.f32.mrb[15].mxu1  ;;  %v873_v36 = vmul.bf16 1069105081, %v820_v9  ;;  %v674_v38 = vsub.f32 %v488_v23, %v351_v10 }
 0x104   : > { %v773_v37 = vsub.f32 %v673_v28, %v1519_v26  ;;  %v676_v39 = vsub.f32 %v601_v29, %v351_v10  ;;  %1289 = vpow.bf16 %v867_v0  ;;  %v675_v41 = vsub.f32 %v490_v1, %v351_v10  ;;  %v331_v20 = vpop.xlane.xlu1 %330 }
 0x105   : > { %v677_v42 = vsub.f32 %v603_v35, %v351_v10  ;;  %1291 = vpow.bf16 %v870_v31  ;;  %v774_v43 = vsub.f32 %v674_v38, %v1510_v21  ;;  %v1282_v45 = vpop.eup %1281  ;;  %v355_v1 = vmul.f32 50.0, %v331_v20  ;;  %v334_v31 = vpop.xlane.xlu0 %333 }
 0x106   : > { %v776_v44 = vsub.f32 %v676_v39, %v1516_v25  ;;  %1293 = vpow.bf16 %v876_v32  ;;  %v775_v46 = vsub.f32 %v675_v41, %v1513_v24 }
 0x107   : > { %v777_v47 = vsub.f32 %v677_v42, %v1519_v26  ;;  %v494_v49 = vpop.f32.mrb[16].mxu0  ;;  %v1284_v51 = vpop.eup %1283  ;;  %1295 = vpow.bf16 %v873_v36  ;;  %v822_v52 = vpack.c.bf16 %v774_v43, %v770_v27 }
 0x108   : > { %v824_v53 = vpack.c.bf16 %v776_v44, %v772_v33  ;;  %v678_v54 = vsub.f32 %v494_v49, %v352_v30  ;;  %v607_v55 = vpop.f32.mrb[16].mxu1  ;;  %v496_v56 = vpop.f32.mrb[17].mxu0  ;;  %v823_v58 = vpack.c.bf16 %v775_v46, %v771_v34  ;;  %943 = vmatprep.subr.bf16.mxu0 %v1284_v51  ;;  %v356_v51 = vmul.f32 50.0, %v334_v31 }
 0x109   : > { %v1286_v57 = vpop.eup %1285  ;;  %v825_v59 = vpack.c.bf16 %v777_v47, %v773_v37  ;;  %v680_v60 = vsub.f32 %v607_v55, %v352_v30  ;;  %v679_v61 = vsub.f32 %v496_v56, %v352_v30  ;;  %v609_v62 = vpop.f32.mrb[17].mxu1  ;;  %v879_v3 = vmul.bf16 1069105081, %v822_v52  ;;  %944 = vmatpush1.bf16.msra.mxu0 %v1282_v45 }
 0x10a   : > { %v498_v63 = vpop.f32.mrb[18].mxu0  ;;  %v1288_v2 = vpop.eup %1287  ;;  %v778_v4 = vsub.f32 %v678_v54, %v1510_v21  ;;  %984 = vmatprep.subr.bf16.mxu1 %v1286_v57  ;;  %v681_v5 = vsub.f32 %v609_v62, %v352_v30  ;;  %v882_v9 = vmul.bf16 1069105081, %v823_v58  ;;  %v885_v17 = vmul.bf16 1069105081, %v824_v53 }
 0x10b   : > { %v611_v6 = vpop.f32.mrb[18].mxu1  ;;  %v500_v7 = vpop.f32.mrb[19].mxu0  ;;  %v888_v10 = vmul.bf16 1069105081, %v825_v59  ;;  %v780_v12 = vsub.f32 %v680_v60, %v1516_v25  ;;  %v779_v13 = vsub.f32 %v679_v61, %v1513_v24  ;;  %985 = vmatpush1.bf16.msra.mxu1 %v1288_v2  ;;  %v682_v19 = vsub.f32 %v498_v63, %v353_v48 }
 0x10c   : > { %v613_v16 = vpop.f32.mrb[19].mxu1  ;;  %v781_v18 = vsub.f32 %v681_v5, %v1519_v26  ;;  %v684_v11 = vsub.f32 %v611_v6, %v353_v48  ;;  %1297 = vpow.bf16 %v879_v3  ;;  %v683_v22 = vsub.f32 %v500_v7, %v353_v48  ;;  %v337_v62 = vpop.xlane.xlu1 %336 }
 0x10d   : > { %v685_v23 = vsub.f32 %v613_v16, %v353_v48  ;;  %1299 = vpow.bf16 %v882_v9  ;;  %v782_v0 = vsub.f32 %v682_v19, %v1510_v21  ;;  %v357_v7 = vmul.f32 50.0, %v337_v62  ;;  %v340_v9 = vpop.xlane.xlu0 %339 }
 0x10e   : > { %v784_v27 = vsub.f32 %v684_v11, %v1516_v25  ;;  %1301 = vpow.bf16 %v888_v10  ;;  %v783_v28 = vsub.f32 %v683_v22, %v1513_v24 }
 0x10f   : > { %v785_v29 = vsub.f32 %v685_v23, %v1519_v26  ;;  %v504_v30 = vpop.f32.mrb[20].mxu0  ;;  %v1290_v32 = vpop.eup %1289  ;;  %1303 = vpow.bf16 %v885_v17  ;;  %v826_v33 = vpack.c.bf16 %v782_v0, %v778_v4 }
 0x110   : > { %v828_v34 = vpack.c.bf16 %v784_v27, %v780_v12  ;;  %v686_v35 = vsub.f32 %v504_v30, %v354_v8  ;;  %v617_v36 = vpop.f32.mrb[20].mxu1  ;;  %v506_v37 = vpop.f32.mrb[21].mxu0  ;;  %v827_v39 = vpack.c.bf16 %v783_v28, %v779_v13 }
 0x111   : > { %v1292_v38 = vpop.eup %1291  ;;  %v829_v40 = vpack.c.bf16 %v785_v29, %v781_v18  ;;  %v688_v41 = vsub.f32 %v617_v36, %v354_v8  ;;  %v687_v42 = vsub.f32 %v506_v37, %v354_v8  ;;  %v619_v43 = vpop.f32.mrb[21].mxu1  ;;  %v891_v46 = vmul.bf16 1069105081, %v826_v33 }
 0x112   : > { %v508_v44 = vpop.f32.mrb[22].mxu0  ;;  %v1294_v45 = vpop.eup %1293  ;;  %v786_v47 = vsub.f32 %v686_v35, %v1510_v21  ;;  %945 = vmatprep.subr.bf16.mxu0 %v1292_v38  ;;  %v689_v48 = vsub.f32 %v619_v43, %v354_v8  ;;  %v894_v53 = vmul.bf16 1069105081, %v827_v39  ;;  %v897_v58 = vmul.bf16 1069105081, %v828_v34 }
 0x113   : > { %v621_v49 = vpop.f32.mrb[22].mxu1  ;;  %v510_v50 = vpop.f32.mrb[23].mxu0  ;;  %v900_v54 = vmul.bf16 1069105081, %v829_v40  ;;  %v788_v55 = vsub.f32 %v688_v41, %v1516_v25  ;;  %986 = vmatprep.subr.bf16.mxu1 %v1294_v45  ;;  %v787_v56 = vsub.f32 %v687_v42, %v1513_v24  ;;  %946 = vmatpush1.bf16.msra.mxu0 %v1290_v32  ;;  %v690_v60 = vsub.f32 %v508_v44, %v355_v1 }
 0x114   : > { %v1296_v52 = vpop.eup %1295  ;;  %v623_v57 = vpop.f32.mrb[23].mxu1  ;;  %v789_v59 = vsub.f32 %v689_v48, %v1519_v26  ;;  %v692_v61 = vsub.f32 %v621_v49, %v355_v1  ;;  %1305 = vpow.bf16 %v891_v46  ;;  %v691_v63 = vsub.f32 %v510_v50, %v355_v1 }
 0x115   : > { %987 = vmatpush1.bf16.msra.mxu1 %v1296_v52  ;;  %v693_v2 = vsub.f32 %v623_v57, %v355_v1  ;;  %1307 = vpow.bf16 %v894_v53  ;;  %v790_v3 = vsub.f32 %v690_v60, %v1510_v21  ;;  %v358_v33 = vmul.f32 50.0, %v340_v9  ;;  %v343_v44 = vpop.xlane.xlu1 %342 }
 0x116   : > { %v792_v4 = vsub.f32 %v692_v61, %v1516_v25  ;;  %1309 = vpow.bf16 %v900_v54  ;;  %v791_v5 = vsub.f32 %v691_v63, %v1513_v24 }
 0x117   : > { %v793_v6 = vsub.f32 %v693_v2, %v1519_v26  ;;  %v514_v8 = vpop.f32.mrb[24].mxu0  ;;  %v1298_v10 = vpop.eup %1297  ;;  %1311 = vpow.bf16 %v897_v58  ;;  %v830_v12 = vpack.c.bf16 %v790_v3, %v786_v47 }
 0x118   : > { %v832_v13 = vpack.c.bf16 %v792_v4, %v788_v55  ;;  %v694_v16 = vsub.f32 %v514_v8, %v356_v51  ;;  %v627_v17 = vpop.f32.mrb[24].mxu1  ;;  %v516_v18 = vpop.f32.mrb[25].mxu0  ;;  %v831_v11 = vpack.c.bf16 %v791_v5, %v787_v56 }
 0x119   : > { %v1300_v19 = vpop.eup %1299  ;;  %v833_v20 = vpack.c.bf16 %v793_v6, %v789_v59  ;;  %v696_v22 = vsub.f32 %v627_v17, %v356_v51  ;;  %v695_v23 = vsub.f32 %v516_v18, %v356_v51  ;;  %v629_v0 = vpop.f32.mrb[25].mxu1  ;;  %v903_v29 = vmul.bf16 1069105081, %v830_v12 }
 0x11a   : > { %v518_v27 = vpop.f32.mrb[26].mxu0  ;;  %v1302_v28 = vpop.eup %1301  ;;  %v794_v1 = vsub.f32 %v694_v16, %v1510_v21  ;;  %947 = vmatprep.subr.bf16.mxu0 %v1300_v19  ;;  %v697_v30 = vsub.f32 %v629_v0, %v356_v51  ;;  %v906_v35 = vmul.bf16 1069105081, %v831_v11  ;;  %v909_v40 = vmul.bf16 1069105081, %v832_v13 }
 0x11b   : > { %v631_v31 = vpop.f32.mrb[26].mxu1  ;;  %v520_v32 = vpop.f32.mrb[27].mxu0  ;;  %v912_v36 = vmul.bf16 1069105081, %v833_v20  ;;  %v796_v37 = vsub.f32 %v696_v22, %v1516_v25  ;;  %988 = vmatprep.subr.bf16.mxu1 %v1302_v28  ;;  %v795_v38 = vsub.f32 %v695_v23, %v1513_v24  ;;  %948 = vmatpush1.bf16.msra.mxu0 %v1298_v10  ;;  %v698_v42 = vsub.f32 %v518_v27, %v357_v7 }
 0x11c   : > { %v1304_v34 = vpop.eup %1303  ;;  %v633_v39 = vpop.f32.mrb[27].mxu1  ;;  %v797_v41 = vsub.f32 %v697_v30, %v1519_v26  ;;  %v700_v43 = vsub.f32 %v631_v31, %v357_v7  ;;  %1313 = vpow.bf16 %v903_v29  ;;  %v699_v45 = vsub.f32 %v520_v32, %v357_v7 }
 0x11d   : > { %989 = vmatpush1.bf16.msra.mxu1 %v1304_v34  ;;  %v701_v46 = vsub.f32 %v633_v39, %v357_v7  ;;  %1315 = vpow.bf16 %v906_v35  ;;  %v798_v47 = vsub.f32 %v698_v42, %v1510_v21  ;;  %v359_v51 = vmul.f32 50.0, %v343_v44 }
 0x11e   : > { %v800_v48 = vsub.f32 %v700_v43, %v1516_v25  ;;  %1317 = vpow.bf16 %v912_v36  ;;  %v799_v49 = vsub.f32 %v699_v45, %v1513_v24 }
 0x11f   : > { %v801_v50 = vsub.f32 %v701_v46, %v1519_v26  ;;  %v524_v52 = vpop.f32.mrb[28].mxu0  ;;  %v1306_v53 = vpop.eup %1305  ;;  %1319 = vpow.bf16 %v909_v40  ;;  %v834_v54 = vpack.c.bf16 %v798_v47, %v794_v1  ;;  %v940_v46 = vld [vmem:[%s1610_s1] sm:$0x3] }
 0x120   : > { %v836_v55 = vpack.c.bf16 %v800_v48, %v796_v37  ;;  %v702_v56 = vsub.f32 %v524_v52, %v358_v33  ;;  %v637_v57 = vpop.f32.mrb[28].mxu1  ;;  %v526_v58 = vpop.f32.mrb[29].mxu0  ;;  %v835_v60 = vpack.c.bf16 %v799_v49, %v795_v38 }
 0x121   : > { %v1308_v59 = vpop.eup %1307  ;;  %v837_v61 = vpack.c.bf16 %v801_v50, %v797_v41  ;;  %v704_v62 = vsub.f32 %v637_v57, %v358_v33  ;;  %v703_v63 = vsub.f32 %v526_v58, %v358_v33  ;;  %v639_v2 = vpop.f32.mrb[29].mxu1  ;;  %v915_v5 = vmul.bf16 1069105081, %v834_v54 }
 0x122   : > { %v528_v3 = vpop.f32.mrb[30].mxu0  ;;  %v1310_v4 = vpop.eup %1309  ;;  %v802_v6 = vsub.f32 %v702_v56, %v1510_v21  ;;  %949 = vmatprep.subr.bf16.mxu0 %v1308_v59  ;;  %v705_v7 = vsub.f32 %v639_v2, %v358_v33  ;;  %v918_v12 = vmul.bf16 1069105081, %v835_v60  ;;  %v921_v19 = vmul.bf16 1069105081, %v836_v55 }
 0x123   : > { %v641_v8 = vpop.f32.mrb[30].mxu1  ;;  %v530_v9 = vpop.f32.mrb[31].mxu0  ;;  %v924_v13 = vmul.bf16 1069105081, %v837_v61  ;;  %v804_v16 = vsub.f32 %v704_v62, %v1516_v25  ;;  %990 = vmatprep.subr.bf16.mxu1 %v1310_v4  ;;  %v803_v17 = vsub.f32 %v703_v63, %v1513_v24  ;;  %950 = vmatpush1.bf16.msra.mxu0 %v1306_v53  ;;  %v706_v20 = vsub.f32 %v528_v3, %v359_v51 }
 0x124   : > { %v1312_v10 = vpop.eup %1311  ;;  %v643_v18 = vpop.f32.mrb[31].mxu1  ;;  %v805_v11 = vsub.f32 %v705_v7, %v1519_v26  ;;  %v708_v22 = vsub.f32 %v641_v8, %v359_v51  ;;  %1321 = vpow.bf16 %v915_v5  ;;  %v707_v23 = vsub.f32 %v530_v9, %v359_v51 }
 0x125   : > { %991 = vmatpush1.bf16.msra.mxu1 %v1312_v10  ;;  %v709_v0 = vsub.f32 %v643_v18, %v359_v51  ;;  %1323 = vpow.bf16 %v918_v12  ;;  %v806_v27 = vsub.f32 %v706_v20, %v1510_v21 }
 0x126   : > { %v808_v28 = vsub.f32 %v708_v22, %v1516_v25  ;;  %1325 = vpow.bf16 %v924_v13  ;;  %v807_v29 = vsub.f32 %v707_v23, %v1513_v24 }
 0x127   : > { %v809_v1 = vsub.f32 %v709_v0, %v1519_v26  ;;  %v1314_v30 = vpop.eup %1313  ;;  %1327 = vpow.bf16 %v921_v19  ;;  %v838_v31 = vpack.c.bf16 %v806_v27, %v802_v6 }
 0x128   : > { %v840_v32 = vpack.c.bf16 %v808_v28, %v804_v16  ;;  %v1316_v33 = vpop.eup %1315  ;;  %v839_v34 = vpack.c.bf16 %v807_v29, %v803_v17 }
 0x129   : > { %v841_v35 = vpack.c.bf16 %v809_v1, %v805_v11  ;;  %v1318_v36 = vpop.eup %1317  ;;  %v927_v37 = vmul.bf16 1069105081, %v838_v31  ;;  %951 = vmatprep.subr.bf16.mxu0 %v1316_v33 }
 0x12a   : > { %v1320_v38 = vpop.eup %1319  ;;  %v930_v39 = vmul.bf16 1069105081, %v839_v34  ;;  %992 = vmatprep.subr.bf16.mxu1 %v1318_v36  ;;  %952 = vmatpush1.bf16.msra.mxu0 %v1314_v30  ;;  %v933_v25 = vmul.bf16 1069105081, %v840_v32 }
 0x12b   : > { %v936_v21 = vmul.bf16 1069105081, %v841_v35  ;;  %993 = vmatpush1.bf16.msra.mxu1 %v1320_v38  ;;  %1329 = vpow.bf16 %v927_v37 }
 0x12c   : > { %1331 = vpow.bf16 %v930_v39 }
 0x12d   : > { %1333 = vpow.bf16 %v936_v21 }
 0x12e   : > { %1335 = vpow.bf16 %v933_v25 }
 0x12f   : > { %v1322_v24 = vpop.eup %1321 }
 0x130   : > { %v1324_v26 = vpop.eup %1323 }
 0x131   : > { %v1326_v40 = vpop.eup %1325  ;;  %953 = vmatprep.subr.bf16.mxu0 %v1324_v26 }
 0x132   : > { %v1328_v41 = vpop.eup %1327  ;;  %994 = vmatprep.subr.bf16.mxu1 %v1326_v40  ;;  %954 = vmatpush1.bf16.msra.mxu0 %v1322_v24 }
 0x133   : > { %995 = vmatpush1.bf16.msra.mxu1 %v1328_v41 }
 0x136   : > { %v1330_v42 = vpop.eup %1329 }
 0x137   : > { %v1332_v43 = vpop.eup %1331 }
 0x138   : > { %v1334_v44 = vpop.eup %1333  ;;  %955 = vmatprep.subr.bf16.mxu0 %v1332_v43 }
 0x139   : > { %v1336_v45 = vpop.eup %1335  ;;  %996 = vmatprep.subr.bf16.mxu1 %v1334_v44  ;;  %956 = vmatpush1.bf16.msra.mxu0 %v1330_v42 }
 0x13a   : > { %997 = vmatpush1.bf16.msra.mxu1 %v1336_v45 }
 0x13c   : > { %974 = vmatmul.mubr.bf16.vlgmr.msra.gmra.mrb[32].mxu0 %v940_v46 }
 0x13d   : > { %1015 = vmatmul.mubr.bf16.vlgmr.msra.gmra.mrb[32].mxu1 %v940_v46 }
 0x20f   : > { %v975_v47 = vpop.f32.mrb[32].mxu0 }
 0x210   : > { %v1016_v48 = vpop.f32.mrb[32].mxu1  ;;  %v977_v49 = vpop.f32.mrb[33].mxu0 }
 0x211   : > { %v1027_v50 = vcombine.low %v975_v47, %v977_v49  ;;  %v1018_v51 = vpop.f32.mrb[33].mxu1  ;;  %v979_v52 = vpop.f32.mrb[34].mxu0 }
 0x212   : > { %v1028_v53 = vcombine.low %v1016_v48, %v1018_v51  ;;  %v1020_v54 = vpop.f32.mrb[34].mxu1  ;;  %v980_v55 = vpop.f32.mrb[35].mxu0 }
 0x213   : > { %v1040_v56 = vadd.f32 0.001, %v1027_v50  ;;  %v1021_v57 = vpop.f32.mrb[35].mxu1 }
 0x214   : > { %v1041_v58 = vadd.f32 0.001, %v1028_v53 }
 0x215   : > { %v1047_v59 = vrot.slane %v1040_v56, %v1497_v14  ;;  %v1051_v60 = vrot.slane %v1040_v56, %v1499_v15 }
 0x216   : > { %v1055_v61 = vrot.slane %v1041_v58, %v1497_v14  ;;  %v1059_v62 = vrot.slane %v1041_v58, %v1499_v15 }
 0x217   : > { %v1067_v63 = vrot.slane %v1047_v59, %v1497_v14  ;;  %v1071_v2 = vrot.slane %v1051_v60, %v1497_v14 }
 0x218   : > { %v1075_v3 = vrot.slane %v1055_v61, %v1497_v14  ;;  %v1079_v4 = vrot.slane %v1059_v62, %v1497_v14 }
 0x219   : > { %v1084_v5 = vcombine.low %v1067_v63, %v1071_v2 }
 0x21a   : > { %v1085_v6 = vcombine.low %v1075_v3, %v1079_v4 }
 0x21b   : > { %1337 = vrcp.f32 %v1084_v5 }
 0x21c   : > { %1339 = vrcp.f32 %v1085_v6 }
 0x225   : > { %v1338_v7 = vpop.eup %1337 }
 0x226   : > { %v1340_v8 = vpop.eup %1339  ;;  %v1089_v15 = vmul.f32 %v1338_v7, %v1027_v50 }
 0x227   : > { %v1091_v9 = vmul.f32 %v1340_v8, %v1028_v53 }
 0x228   : > { %1092 = vst [vmem:[%s254_s29] sm:$0x77] %v1089_v15 }
 0x229   : > { %1093 = vst [vmem:[%s254_s29 + $0x8] sm:$0x77] %v1091_v9 }
 0x22a PF: > { %s13_s14 = sadd.s32 1, %s1363_s14   ;;  %s1613_s12 = smov %s1359_s13 }
 0x22b   : > { %p10_p5 = scmp.ge.s32.totalorder %s13_s14, 4   ;;  %s1614_s13 = smov %s1616_s15 }
 0x22d   :  { %12 = sbr.rel (!%p10_p5) target bundleno = 2 (0x2), region = 76 }

</bundles_post_ra>
